<compile_context>
chip_gen: v5e
topology: v5e:2x2
jax: 0.10.0
libtpu: 0.0.40
codegen_flags: <defaults>
</compile_context>

<pallas_src>
import functools

import numpy as np
import jax
import jax.numpy as jnp
from jax.experimental import pallas as pl
from jax.experimental.pallas import tpu as pltpu


def _round_up(x, m):
    return (x + m - 1) // m * m


def _batch_tiling(bs, block_b):
    """Pick a batch tile (multiple of 8) that minimises padded rows."""
    block_b = max(8, _round_up(block_b, 8))
    bs8 = _round_up(max(bs, 1), 8)
    if bs8 <= block_b:
        return bs8, bs8                      # single tile, <=7 padded rows
    ntiles = -(-bs8 // block_b)              # ceil
    tb = _round_up(-(-bs8 // ntiles), 8)
    return tb, ntiles * tb


def _gm_fused_kernel(x_ref, w_ref, b_ref, prob_ref, mean_ref, logvar_ref, *, nmnc, nc):
    """One batch tile: single bf16 MXU pass over the concatenated
    [mean | log_var | prob(padded)] weight, in-register split, fused softmax."""
    # bf16 x bf16 -> f32 accumulation (no operand upcast).
    y = jnp.dot(x_ref[...], w_ref[...], preferred_element_type=jnp.float32)
    y = y + b_ref[...].astype(jnp.float32)

    # Flat lane-dense slabs; reshaped to (bs, n_mel, n_comp) in the wrapper.
    mean_ref[...] = y[:, :nmnc].astype(mean_ref.dtype)
    logvar_ref[...] = y[:, nmnc:2 * nmnc].astype(logvar_ref.dtype)

    # Softmax over the nc valid prob lanes only.
    logits = y[:, 2 * nmnc:2 * nmnc + nc]
    m = jnp.max(logits, axis=-1, keepdims=True)
    e = jnp.exp(logits - m)
    denom = jnp.sum(e, axis=-1, keepdims=True)
    prob_ref[...] = (e * pl.reciprocal(denom, approx=True)).astype(prob_ref.dtype)


def _gm_prob_kernel(x_ref, w_ref, b_ref, prob_ref):
    """fixed_gaussian=True path: prob head + softmax only.
    NOTE: per perf review this path is purely x-DMA bound; a plain XLA
    matmul+softmax that fuses with the producer of `outputs` is equally good —
    kept in Pallas for module parity, using the largest batch tile that fits."""
    logits = jnp.dot(x_ref[...], w_ref[...], preferred_element_type=jnp.float32)
    logits = logits + b_ref[...].astype(jnp.float32)
    m = jnp.max(logits, axis=-1, keepdims=True)
    e = jnp.exp(logits - m)
    denom = jnp.sum(e, axis=-1, keepdims=True)
    prob_ref[...] = (e * pl.reciprocal(denom, approx=True)).astype(prob_ref.dtype)


class GaussianMixture:
    """JAX/Pallas port of flowtron.GaussianMixture (forward semantics only)."""

    def __init__(self, key, n_hidden, n_components, n_mel_channels,
                 fixed_gaussian, mean_scale, compute_dtype=jnp.bfloat16):
        self.n_hidden = n_hidden
        self.n_components = n_components
        self.n_mel_channels = n_mel_channels
        self.fixed_gaussian = fixed_gaussian
        self.mean_scale = mean_scale
        self.compute_dtype = compute_dtype

        nc, nm = n_components, n_mel_channels
        ks = jax.random.split(key, 6)

        def xavier(k, fan_in, fan_out):
            lim = float(np.sqrt(6.0 / (fan_in + fan_out)))
            return jax.random.uniform(k, (fan_in, fan_out), jnp.float32, -lim, lim)

        def bias(k, fan_in, fan_out):
            lim = float(1.0 / np.sqrt(fan_in))
            return jax.random.uniform(k, (1, fan_out), jnp.float32, -lim, lim)

        # Weights stored pre-transposed (in, out), bf16 operands; biases stay f32.
        self.wp = xavier(ks[0], n_hidden, nc).astype(compute_dtype)
        self.bp = bias(ks[1], n_hidden, nc)

        if not fixed_gaussian:
            self.wm = xavier(ks[2], n_hidden, nm * nc).astype(compute_dtype)
            self.bm = bias(ks[3], n_hidden, nm * nc)
            self.wv = xavier(ks[4], n_hidden, nm * nc).astype(compute_dtype)
            self.bv = bias(ks[5], n_hidden, nm * nc)

            # Fused weight: [mean | log_var | prob padded to 128 lanes].
            ncp = _round_up(nc, 128)
            wp_pad = jnp.zeros((n_hidden, ncp), compute_dtype).at[:, :nc].set(self.wp)
            bp_pad = jnp.zeros((1, ncp), jnp.float32).at[:, :nc].set(self.bp)
            self.w_cat = jnp.concatenate([self.wm, self.wv, wp_pad], axis=1)
            self.b_cat = jnp.concatenate([self.bm, self.bv, bp_pad], axis=1)
        else:
            # Same construction as the torch module (deterministic selection here).
            rng = np.random.default_rng(0)
            ids = rng.choice(nm, nc, replace=False)
            means = np.eye(nm, dtype=np.float32)[ids] * mean_scale     # (n_comp, n_mel)
            self.mean = jnp.asarray(means.T[None])                     # (1, n_mel, n_comp)
            self.log_var = jnp.zeros((1, nm, nc), jnp.float32)

    # ------------------------------------------------------------------ #

    def _compiler_params(self, est_bytes):
        kwargs = dict(dimension_semantics=("parallel",))
        # Only raise the scoped-VMEM limit when the footprint actually needs it.
        if est_bytes > (30 << 20):
            kwargs["vmem_limit_bytes"] = int(min(est_bytes, 100 << 20))
        return pltpu.CompilerParams(**kwargs)

    def __call__(self, outputs, bs, *, block_b=512, out_dtype=None):
        n_hidden = outputs.shape[-1]
        nc = self.n_components
        nm = self.n_mel_channels
        nmnc = nm * nc
        out_dtype = outputs.dtype if out_dtype is None else out_dtype

        tb, bs_pad = _batch_tiling(bs, block_b)
        x = outputs.astype(self.compute_dtype)
        if bs_pad != bs:
            x = jnp.pad(x, ((0, bs_pad - bs), (0, 0)))
        grid = (bs_pad // tb,)

        isz_c = jnp.dtype(self.compute_dtype).itemsize
        isz_o = jnp.dtype(out_dtype).itemsize

        if not self.fixed_gaussian:
            ntot = self.w_cat.shape[1]
            est = 2 * (tb * n_hidden * isz_c        # x tile (double-buffered)
                       + n_hidden * ntot * isz_c    # resident fused weight
                       + ntot * 4                   # fused bias
                       + tb * (nc + 2 * nmnc) * isz_o)
            est += 4 << 20
            cparams = self._compiler_params(est)

            kernel = functools.partial(_gm_fused_kernel, nmnc=nmnc, nc=nc)
            prob, mean_flat, logvar_flat = pl.pallas_call(
                kernel,
                out_shape=(
                    jax.ShapeDtypeStruct((bs_pad, nc), out_dtype),
                    jax.ShapeDtypeStruct((bs_pad, nmnc), out_dtype),
                    jax.ShapeDtypeStruct((bs_pad, nmnc), out_dtype),
                ),
                grid_spec=pltpu.PrefetchScalarGridSpec(
                    num_scalar_prefetch=0,
                    grid=grid,
                    in_specs=[
                        pl.BlockSpec((tb, n_hidden), lambda i: (i, 0)),   # activations
                        pl.BlockSpec((n_hidden, ntot), lambda i: (0, 0)), # fused W (resident)
                        pl.BlockSpec((1, ntot), lambda i: (0, 0)),        # fused bias
                    ],
                    out_specs=(
                        pl.BlockSpec((tb, nc), lambda i: (i, 0)),
                        pl.BlockSpec((tb, nmnc), lambda i: (i, 0)),
                        pl.BlockSpec((tb, nmnc), lambda i: (i, 0)),
                    ),
                ),
                compiler_params=cparams,
            )(x, self.w_cat, self.b_cat)

            prob = prob[:bs]
            mean = mean_flat[:bs].reshape(bs, nm, nc)     # matches torch .view(bs, n_mel, n_comp)
            log_var = logvar_flat[:bs].reshape(bs, nm, nc)
            return mean, log_var, prob
        else:
            est = 2 * (tb * n_hidden * isz_c + n_hidden * nc * isz_c
                       + nc * 4 + tb * nc * isz_o) + (4 << 20)
            cparams = self._compiler_params(est)

            prob = pl.pallas_call(
                _gm_prob_kernel,
                out_shape=jax.ShapeDtypeStruct((bs_pad, nc), out_dtype),
                grid_spec=pltpu.PrefetchScalarGridSpec(
                    num_scalar_prefetch=0,
                    grid=grid,
                    in_specs=[
                        pl.BlockSpec((tb, n_hidden), lambda i: (i, 0)),
                        pl.BlockSpec((n_hidden, nc), lambda i: (0, 0)),
                        pl.BlockSpec((1, nc), lambda i: (0, 0)),
                    ],
                    out_specs=pl.BlockSpec((tb, nc), lambda i: (i, 0)),
                ),
                compiler_params=cparams,
            )(x, self.wp, self.bp)
            # Fixed buffers returned as-is (shape (1, n_mel, n_comp)), like the torch module.
            return self.mean, self.log_var, prob[:bs]


if __name__ == "__main__":
    key = jax.random.PRNGKey(0)
    bs, n_hidden, n_comp, n_mel = 16, 32, 4, 8
    k_model, k_model_fixed, k_x = jax.random.split(key, 3)
    x = jax.random.normal(k_x, (bs, n_hidden), jnp.float32)

    # --- non-fixed gaussian path: fused [mean|log_var|prob] matmul + softmax ---
    gm = GaussianMixture(k_model, n_hidden, n_comp, n_mel,
                         fixed_gaussian=False, mean_scale=3.0)
    mean, log_var, prob = gm(x, bs, block_b=8)   # forces a 2-step batch grid
    mean, log_var, prob = jax.block_until_ready((mean, log_var, prob))

    # Host-side f32 reference using the same bf16-rounded operands.
    x_np = np.asarray(x.astype(gm.compute_dtype), np.float32)
    wp_np = np.asarray(gm.wp, np.float32); bp_np = np.asarray(gm.bp, np.float32)
    wm_np = np.asarray(gm.wm, np.float32); bm_np = np.asarray(gm.bm, np.float32)
    wv_np = np.asarray(gm.wv, np.float32); bv_np = np.asarray(gm.bv, np.float32)

    logits_ref = x_np @ wp_np + bp_np
    e_ref = np.exp(logits_ref - logits_ref.max(-1, keepdims=True))
    prob_ref = e_ref / e_ref.sum(-1, keepdims=True)
    mean_ref = (x_np @ wm_np + bm_np).reshape(bs, n_mel, n_comp)
    logv_ref = (x_np @ wv_np + bv_np).reshape(bs, n_mel, n_comp)

    assert np.allclose(np.asarray(prob), prob_ref, rtol=2e-3, atol=2e-3), "prob mismatch"
    assert np.allclose(np.asarray(mean), mean_ref, rtol=2e-3, atol=2e-3), "mean mismatch"
    assert np.allclose(np.asarray(log_var), logv_ref, rtol=2e-3, atol=2e-3), "log_var mismatch"

    # --- fixed gaussian path: prob head in-kernel; mean/log_var are fixed buffers ---
    gmf = GaussianMixture(k_model_fixed, n_hidden, n_comp, n_mel,
                          fixed_gaussian=True, mean_scale=3.0)
    mean_f, logvar_f, prob_f = gmf(x, bs)
    prob_f = jax.block_until_ready(prob_f)

    logits_f = x_np @ np.asarray(gmf.wp, np.float32) + np.asarray(gmf.bp, np.float32)
    e_f = np.exp(logits_f - logits_f.max(-1, keepdims=True))
    prob_f_ref = e_f / e_f.sum(-1, keepdims=True)
    assert np.allclose(np.asarray(prob_f), prob_f_ref, rtol=2e-3, atol=2e-3), "fixed prob mismatch"
    assert mean_f.shape == (1, n_mel, n_comp) and logvar_f.shape == (1, n_mel, n_comp)

    print("KERNEL_OK")
</pallas_src>

<mosaic_0001>
module attributes {stable_mosaic.version = 11 : i64} {
  func.func @_gm_fused_kernel(%arg0: i32, %arg1: memref<8x32xbf16, #tpu.memory_space<vmem>>, %arg2: memref<32x192xbf16, #tpu.memory_space<vmem>>, %arg3: memref<1x192xf32, #tpu.memory_space<vmem>>, %arg4: memref<8x4xf32, #tpu.memory_space<vmem>>, %arg5: memref<8x32xf32, #tpu.memory_space<vmem>>, %arg6: memref<8x32xf32, #tpu.memory_space<vmem>>) attributes {dimension_semantics = [#tpu.dimension_semantics<parallel>], iteration_bounds = array<i64: 2>, scalar_prefetch = 0 : i64, scratch_operands = 0 : i64, tpu.core_type = #tpu.core_type<tc>, window_params = [{transform_indices = @transform_0, window_bounds = array<i64: 8, 32>}, {pipeline_mode = #tpu.pipeline_mode<synchronous>, transform_indices = @transform_1, window_bounds = array<i64: 32, 192>}, {pipeline_mode = #tpu.pipeline_mode<synchronous>, transform_indices = @transform_2, window_bounds = array<i64: 1, 192>}, {transform_indices = @transform_3, window_bounds = array<i64: 8, 4>}, {transform_indices = @transform_4, window_bounds = array<i64: 8, 32>}, {transform_indices = @transform_5, window_bounds = array<i64: 8, 32>}]} {
    %c0 = arith.constant 0 : index
    %c0_0 = arith.constant 0 : index
    %0 = vector.load %arg1[%c0, %c0_0] : memref<8x32xbf16, #tpu.memory_space<vmem>>, vector<8x32xbf16>
    %c0_1 = arith.constant 0 : index
    %c0_2 = arith.constant 0 : index
    %1 = vector.load %arg2[%c0_1, %c0_2] : memref<32x192xbf16, #tpu.memory_space<vmem>>, vector<32x192xbf16>
    %cst = arith.constant dense<0.000000e+00> : vector<8x192xf32>
    %2 = tpu.matmul %0, %1, %cst {dimension_numbers = #tpu.dot_dimension_numbers<[1], [0], [0], [1], [0, 0, 1, 1], [], []>} : vector<8x32xbf16>, vector<32x192xbf16>, vector<8x192xf32> -> vector<8x192xf32>
    %c0_3 = arith.constant 0 : index
    %c0_4 = arith.constant 0 : index
    %3 = vector.load %arg3[%c0_3, %c0_4] : memref<1x192xf32, #tpu.memory_space<vmem>>, vector<1x192xf32>
    %4 = vector.broadcast %3 : vector<1x192xf32> to vector<8x192xf32>
    %5 = arith.addf %2, %4 : vector<8x192xf32>
    %6 = vector.extract_strided_slice %5 {offsets = [0, 0], sizes = [8, 32], strides = [1, 1]} : vector<8x192xf32> to vector<8x32xf32>
    %c0_5 = arith.constant 0 : index
    %c0_6 = arith.constant 0 : index
    %7 = vector.load %arg5[%c0_5, %c0_6] : memref<8x32xf32, #tpu.memory_space<vmem>>, vector<8x32xf32>
    tpu.vector_store %arg5[%c0_5, %c0_6], %6 {strides = array<i32>} : memref<8x32xf32, #tpu.memory_space<vmem>>, vector<8x32xf32>,
    %8 = vector.extract_strided_slice %5 {offsets = [0, 32], sizes = [8, 32], strides = [1, 1]} : vector<8x192xf32> to vector<8x32xf32>
    %c0_7 = arith.constant 0 : index
    %c0_8 = arith.constant 0 : index
    %9 = vector.load %arg6[%c0_7, %c0_8] : memref<8x32xf32, #tpu.memory_space<vmem>>, vector<8x32xf32>
    tpu.vector_store %arg6[%c0_7, %c0_8], %8 {strides = array<i32>} : memref<8x32xf32, #tpu.memory_space<vmem>>, vector<8x32xf32>,
    %10 = vector.extract_strided_slice %5 {offsets = [0, 64], sizes = [8, 4], strides = [1, 1]} : vector<8x192xf32> to vector<8x4xf32>
    %cst_9 = arith.constant dense<0xFF800000> : vector<8xf32>
    %11 = vector.multi_reduction <maximumf>, %10, %cst_9 [1] : vector<8x4xf32> to vector<8xf32>
    %12 = vector.shape_cast %11 : vector<8xf32> to vector<8x1xf32>
    %13 = vector.broadcast %12 : vector<8x1xf32> to vector<8x4xf32>
    %14 = arith.subf %10, %13 : vector<8x4xf32>
    %15 = math.exp %14 : vector<8x4xf32>
    %cst_10 = arith.constant dense<0.000000e+00> : vector<8xf32>
    %16 = vector.multi_reduction <add>, %15, %cst_10 [1] : vector<8x4xf32> to vector<8xf32>
    %17 = vector.shape_cast %16 : vector<8xf32> to vector<8x1xf32>
    %18 = tpu.reciprocal %17 {approx = true} : vector<8x1xf32> -> vector<8x1xf32>
    %19 = vector.broadcast %18 : vector<8x1xf32> to vector<8x4xf32>
    %20 = arith.mulf %15, %19 : vector<8x4xf32>
    %c0_11 = arith.constant 0 : index
    %c0_12 = arith.constant 0 : index
    %21 = vector.load %arg4[%c0_11, %c0_12] : memref<8x4xf32, #tpu.memory_space<vmem>>, vector<8x4xf32>
    tpu.vector_store %arg4[%c0_11, %c0_12], %20 {strides = array<i32>} : memref<8x4xf32, #tpu.memory_space<vmem>>, vector<8x4xf32>,
    return
  }
  func.func @transform_0(%arg0: i32) -> (i32, i32) {
    %c0_i32 = arith.constant 0 : i32
    %c0_i32_0 = arith.constant 0 : i32
    return %arg0, %c0_i32 : i32, i32
  }
  func.func @transform_1(%arg0: i32) -> (i32, i32) {
    %c0_i32 = arith.constant 0 : i32
    %c0_i32_0 = arith.constant 0 : i32
    %c0_i32_1 = arith.constant 0 : i32
    return %c0_i32, %c0_i32_0 : i32, i32
  }
  func.func @transform_2(%arg0: i32) -> (i32, i32) {
    %c0_i32 = arith.constant 0 : i32
    %c0_i32_0 = arith.constant 0 : i32
    %c0_i32_1 = arith.constant 0 : i32
    return %c0_i32, %c0_i32_0 : i32, i32
  }
  func.func @transform_3(%arg0: i32) -> (i32, i32) {
    %c0_i32 = arith.constant 0 : i32
    %c0_i32_0 = arith.constant 0 : i32
    return %arg0, %c0_i32 : i32, i32
  }
  func.func @transform_4(%arg0: i32) -> (i32, i32) {
    %c0_i32 = arith.constant 0 : i32
    %c0_i32_0 = arith.constant 0 : i32
    return %arg0, %c0_i32 : i32, i32
  }
  func.func @transform_5(%arg0: i32) -> (i32, i32) {
    %c0_i32 = arith.constant 0 : i32
    %c0_i32_0 = arith.constant 0 : i32
    return %arg0, %c0_i32 : i32, i32
  }
}

</mosaic_0001>

<bundles_post_ra>
// kernel: tpu_custom_call.1
= control target key start
LH: loop header
LB: loop body
LE: loop exit
PB: predicated region body
PF: predicated region fallthrough
CT: control target
= control target key end

     0   :  { %11 = vsyncpa [#allocation3], 0  ;;  %s1066_s0 = inlined_call_operand.hbm [shape: bf16[16,32], index: 0, kind: input, shape index: {}]   ;;  %s1067_s1 = inlined_call_operand.hbm [shape: bf16[32,192], index: 1, kind: input, shape index: {}]   ;;  %s1068_s2 = inlined_call_operand.hbm [shape: f32[1,192], index: 2, kind: input, shape index: {}]   ;;  %s1069_s3 = inlined_call_operand.vmem [shape: f32[16,4], index: 3, kind: output, shape index: {0}]   ;;  %s1070_s4 = inlined_call_operand.hbm [shape: f32[16,32], index: 4, kind: output, shape index: {1}]   ;;  %s1071_s5 = inlined_call_operand.hbm [shape: f32[16,32], index: 5, kind: output, shape index: {2}]  }
   0x1   :  { %13 = vsyncpa [#allocation3 + $0x1], 0 }
   0x2   :  { %14 = vsyncpa [#allocation6], 0 }
   0x3   :  { %15 = vsyncpa [#allocation4], 0 }
   0x4   :  { %17 = vsyncpa [#allocation4 + $0x1], 0 }
   0x5   :  { %18 = vsyncpa [#allocation10], 0 }
   0x6   :  { %20 = vsyncpa [#allocation10 + $0x1], 0  ;;  %s890_s18 = smov 0   ;;  %s892_s19 = smov 0  }
   0x7   :  { %s894_s20 = smov 0   ;;  %s896_s21 = smov 0  }
   0x8 LB: > { %s188_s24 = sshll.u32 %s1067_s1, 4  ;;  %s914_s25 = sadd.s32 4294967295, %s852_s21   ;;  %s852_s21 = sphi %s896_s21, %s1086_s21   ;;  %s848_s20 = sphi %s894_s20, %s1085_s20   ;;  %s844_s19 = sphi %s892_s19, %s1084_s19   ;;  %s840_s18 = sphi %s890_s18, %s1083_s18   ;;  %s189_s24 = int_to_ptr.hbm [resolvable:$true] %s188_s24 }
   0x9   : > { %p550_p0 = scmp.ge.s32.totalorder %s852_s21, 1  ;;  %p47_p1 = scmp.eq.s32.totalorder %s914_s25, 0 }
   0xa   : > { %p177_p2 = scmp.lt.s32.totalorder %s852_s21, 3  ;;  %s854_s27 = smov [#allocation5]  }
   0xb   : > { %s190_s28 = sshll.u32 %s854_s27, 4  ;;  %s203_s6 = sshll.u32 %s1068_s2, 4  ;;  %s191_s28 = int_to_ptr.vmem [resolvable:$true] %s190_s28  ;;  %s204_s6 = int_to_ptr.hbm [resolvable:$true] %s203_s6 }
   0xc   : > { %p919_p3 = pnand %p550_p0, %p177_p2  ;;  %s855_s7 = smov [#allocation7]  }
   0xd   : > { %s205_s8 = sshll.u32 %s855_s7, 4  ;;  %s856_s9 = smov 128   ;;  %s206_s8 = int_to_ptr.vmem [resolvable:$true] %s205_s8 }
   0xe   : > { %p594_p4 = pneg %p919_p3  ;;  %s857_s10 = smov 8  }
   0xf   : > { %s549_s11 = sadd.s32 4294967294, %s852_s21   ;;  %s933_s12 = sadd.s32 1, %s852_s21  }
  0x10   : > { %p595_p6 = pnand %p594_p4, %p47_p1  ;;  %s30_s13 = ssub.s32 %s852_s21, %s933_s12 }
  0x11   : > { %s33_s14 = sadd.s32 1, %s848_s20  ;;  %p31_p7 = scmp.eq.s32.totalorder %s30_s13, 0 }
  0x12   : > { %597 = dma.hbm_to_vmem [thread:$0]  (!%p595_p6), %s189_s24, 512, %s191_s28, [#allocation6], %s856_s9, %s856_s9, %s857_s10  }
  0x13   : > { %600 = dma.hbm_to_vmem [thread:$0]  (!%p595_p6), %s204_s6, 32, %s206_s8, [#allocation6]  }
  0x14   : > { %p40_p8 = scmp.ne.s32.totalorder %s848_s20, %s844_s19  ;;  %p41_p9 = scmp.eq.s32.totalorder %s852_s21, 0 }
  0x15   : > { %p46_p10 = scmp.ne.s32.totalorder %s844_s19, %s840_s18  ;;  %p138_p13 = scmp.eq.s32.totalorder %s914_s25, 1 }
  0x16   : > { %s944_s15 = scalar_select %p31_p7, %s848_s20, %s33_s14  }
  0x17   : > { %p946_p11 = por %p41_p9, %p40_p8  ;;  %p952_p12 = por %p47_p1, %p46_p10 }
  0x18   : > { %p144_p0 = scmp.eq.s32.totalorder %s549_s11, 1  ;;  %p614_p2 = scmp.lt.s32.totalorder %s852_s21, 2 }
  0x19   : > { %s216_s22 = sand.u32 1, %s848_s20   ;;  %p959_p4 = por %p138_p13, %p40_p8 }
  0x1a   : > { %p963_p6 = por %p144_p0, %p46_p10  ;;  %s554_s27 = sshll.u32 %s216_s22, 2 }
  0x1b   : > { %s555_s28 = sshll.u32 %s852_s21, 2  ;;  %s220_s7 = scalar_lea.vmem [#allocation2], %s554_s27 }
  0x1c   : > { %s224_s6 = scalar_lea.hbm %s1066_s0, %s555_s28  ;;  %s228_s8 = sshll.u32 %s220_s7, 4  ;;  %s229_s8 = int_to_ptr.vmem [resolvable:$true] %s228_s8 }
  0x1d   : > { %s226_s9 = sshll.u32 %s224_s6, 4  ;;  %p973_p7 = pnand %p614_p2, %p946_p11  ;;  %s227_s9 = int_to_ptr.hbm [resolvable:$true] %s226_s9 }
  0x1e   : > { %s217_s11 = scalar_lea.sflag [#allocation3], %s216_s22  ;;  %s720_s13 = sshra.s32 %s227_s9, 4  ;;  %s721_s13 = int_to_ptr.hbm [resolvable:$true] %s720_s13 }
  0x1f   : > { %s722_s14 = scalar_lea.hbm %s721_s13, 4  ;;  %p724_p9 = pneg %p973_p7 }
  0x20   : > { %p723_p8 = scmp.ne.s32.totalorder %s721_s13, %s722_s14  ;;  %s727_s29 = scalar_lea.hbm %s1066_s0, 8 }
  0x21   : > { %p728_p11 = scmp.lt.s32.totalorder %s721_s13, %s1066_s0  ;;  %p729_p0 = scmp.lt.s32.totalorder %s727_s29, %s722_s14 }
  0x22   : > { %p725_p10 = pnand %p724_p9, %p723_p8 }
  0x23   : > { %p730_p2 = por %p729_p0, %p728_p11 }
  0x24   : > { %p726_p13 = pneg %p725_p10 }
  0x26   : > { %p731_p5 = pnand %p730_p2, %p726_p13 }
  0x28   : > { %734 = shalt.err (!%p731_p5)
}
  0x29   : > { %604 = dma.hbm_to_vmem [thread:$0]  (!%p973_p7), %s227_s9, 64, %s229_s8, %s217_s11  }
  0x2a   : > { %237 = sbr.rel (%p919_p3) target bundleno = 649 (0x289), region = 32  ;;  %s990_s22 = sand.u32 (!%p919_p3), 1, %s844_s19  }
  0x2b   : > { %s557_s6 = sshll.u32 (!%p919_p3), %s990_s22, 2  ;;  %s240_s7 = scalar_lea.sflag (!%p919_p3), [#allocation3], %s990_s22 }
  0x2c   : > { %s243_s27 = scalar_lea.vmem (!%p919_p3), [#allocation2], %s557_s6 }
  0x2f   : > { %823 = dma.done.wait (%p952_p12), %s240_s7, 64  }
  0x30   : > { %825 = vsyncadd (%p952_p12), %s240_s7, 4294967232 }
  0x31   : > { %827 = dma.done.wait (%p47_p1), [#allocation6], 544  }
  0x32   : > { %829 = vsyncadd (%p47_p1), [#allocation6], 4294966752  ;;  %v569_v0 = vld [vmem:[#allocation5 + $0x10] sm:$0xf]  ;;  %v579_v1 = vld [vmem:[#allocation5 + $0x14] sm:$0xf0] }
  0x33   : > { %v565_v2 = vld [vmem:[#allocation5] sm:$0xf]  ;;  %v570_v3 = vor.u32 %v579_v1, %v569_v0  ;;  %v578_v4 = vld [vmem:[#allocation5 + $0x4] sm:$0xf0]  ;;  %v295_v6 = vld [vmem:[%s243_s27] sm:$0xf] }
  0x34   : > { %v566_v5 = vor.u32 %v578_v4, %v565_v2  ;;  %vm316_vm0 = vcmask 261120   ;;  %v300_v7 = vld [vmem:[#allocation7] sm:$0x3]  ;;  %s1072_s26 = sshll.u32 %s990_s22, 3  ;;  %vm339_vm1 = vcmask 556544   ;;  %s1073_s8 = smov 64  }
  0x35   : > { %326 = vmatpush.bf16.msra.mxu0 %v570_v3  ;;  %v302_v8 = vperm.slane %v300_v7, 0  ;;  %s282_s17 = scalar_lea.vmem [#allocation8], %s1072_s26  ;;  %vm350_vm2 = vcmask 31744   ;;  %s859_s9 = smov 96  }
  0x36   : > { %s574_s10 = sshll.u32 %s914_s25, 3  ;;  %s386_s28 = sshll.u32 %s282_s17, 4  ;;  %s387_s28 = int_to_ptr.vmem [resolvable:$true] %s386_s28 }
  0x37   : > { %s384_s14 = scalar_lea.hbm %s1070_s4, %s574_s10  ;;  %s366_s30 = scalar_lea.sflag [#allocation4], %s990_s22 }
  0x38   : > { %s388_s29 = sshll.u32 %s384_s14, 4  ;;  %s389_s29 = int_to_ptr.hbm [resolvable:$true] %s388_s29 }
  0x39   : > { %327 = vmatpush.bf16.msra.mxu0 %v566_v5  ;;  %s764_s16 = sshra.s32 %s389_s29, 4  ;;  %s765_s16 = int_to_ptr.hbm [resolvable:$true] %s764_s16 }
  0x3a   : > { %s766_s6 = scalar_lea.hbm %s765_s16, 8  ;;  %p771_p12 = scmp.lt.s32.totalorder %s765_s16, %s1070_s4 }
  0x3b   : > { %p767_p1 = scmp.ne.s32.totalorder %s765_s16, %s766_s6 }
  0x3c   : > { %571 = vmatmul.msk.bf16.vlgmr.msra.gmra.mxu0 %vm316_vm0, %v295_v6 }
  0x3d   : > { %p768_p3 = pnand %p767_p1, %p959_p4 }
  0x3f   : > { %p769_p5 = pneg %p768_p3 }
  0xb9   : > { %v329_v9 = vpop.f32.mrf.mxu0 }
  0xba   : > { %v330_v10 = vadd.f32 %v329_v9, %v302_v8 }
  0xbc   : > { %v340_v11 = vsel %vm339_vm1, %v330_v10, -inf  ;;  %333 = vst.msk [vmem:[%s282_s17] sm:$0xff] %vm316_vm0, %v330_v10 }
  0xbd   : > { %341 = vmax.xlane.f32.xlu0 %v340_v11 }
  0xc1   : > { %v331_v12 = vpop.f32.mrf.mxu0 }
 0x130   : > { %v342_v13 = vpop.xlane.xlu0 %341 }
 0x131   : > { %v343_v14 = vsub.f32 %v330_v10, %v342_v13 }
 0x133   : > { %v344_v15 = vmul.f32 1.442695, %v343_v14 }
 0x135   : > { %656 = vpow2.f32 %v344_v15 }
 0x13b   : > { %v657_v16 = vpop.eup %656 }
 0x13c   : > { %347 = vrot.lane.b32.xlu0 %v657_v16, %s1073_s8 }
 0x1ae   : > { %v348_v17 = vpop.permute.xlu0 %347 }
 0x1af   : > { %v351_v18 = vsel %vm350_vm2, %v348_v17, 0.0 }
 0x1b0   : > { %352 = vadd.xlane.f32.xlu1 %v351_v18 }
 0x1c9   : > { %335 = vrot.lane.b32.xlu1 %v330_v10, %s859_s9  ;;  %s770_s9 = scalar_lea.hbm %s1070_s4, 16 }
 0x1ca   : > { %p772_p7 = scmp.lt.s32.totalorder %s770_s9, %s766_s6 }
 0x1cc   : > { %p773_p8 = por %p772_p7, %p771_p12 }
 0x1ce   : > { %p774_p9 = pnand %p773_p8, %p769_p5 }
 0x1d0   : > { %777 = shalt.err (!%p774_p9)
}
 0x1d1   : > { %590 = dma.vmem_to_hbm [thread:$0]  (%p959_p4), %s387_s28, 128, %s389_s29, %s366_s30  }
 0x1d2   : > { %s1080_s17 = smov 64   ;;  %s398_s26 = scalar_lea.hbm %s1071_s5, %s574_s10 }
 0x1d3   : > { %s1081_s8 = sshll.u32 %s990_s22, 3  ;;  %s402_s6 = sshll.u32 %s398_s26, 4  ;;  %s403_s6 = int_to_ptr.hbm [resolvable:$true] %s402_s6 }
 0x1d4   : > { %s289_s14 = scalar_lea.vmem [#allocation9], %s1081_s8  ;;  %s371_s28 = scalar_lea.sflag [#allocation10], %s990_s22 }
 0x1d5   : > { %s400_s16 = sshll.u32 %s289_s14, 4  ;;  %s792_s29 = sshra.s32 %s403_s6, 4  ;;  %s401_s16 = int_to_ptr.vmem [resolvable:$true] %s400_s16  ;;  %s793_s29 = int_to_ptr.hbm [resolvable:$true] %s792_s29 }
 0x1d6   : > { %s794_s30 = scalar_lea.hbm %s793_s29, 8  ;;  %s798_s10 = scalar_lea.hbm %s1071_s5, 16 }
 0x1d7   : > { %p795_p10 = scmp.ne.s32.totalorder %s793_s29, %s794_s30  ;;  %p799_p0 = scmp.lt.s32.totalorder %s793_s29, %s1071_s5 }
 0x1d8   : > { %p800_p2 = scmp.lt.s32.totalorder %s798_s10, %s794_s30 }
 0x1d9   : > { %p796_p13 = pnand %p795_p10, %p959_p4 }
 0x1da   : > { %p801_p1 = por %p800_p2, %p799_p0 }
 0x1db   : > { %p797_p11 = pneg %p796_p13 }
 0x1dd   : > { %p802_p3 = pnand %p801_p1, %p797_p11 }
 0x223   : > { %v353_v19 = vpop.xlane.xlu1 %352 }
 0x224   : > { %658 = vrcp.f32 %v353_v19 }
 0x22a   : > { %v659_v20 = vpop.eup %658 }
 0x22b   : > { %v355_v21 = vmul.f32 %v659_v20, %v657_v16 }
 0x22d   : > { %357 = vrot.lane.b32.xlu2 %v355_v21, %s1080_s17 }
 0x23b   : > { %v336_v22 = vpop.permute.xlu1 %335 }
 0x23c   : > { %338 = vst.msk [vmem:[%s289_s14] sm:$0xff] %vm316_vm0, %v336_v22 }
 0x23d   : > { %805 = shalt.err (!%p802_p3)
}
 0x23e   : > { %591 = dma.vmem_to_hbm [thread:$0]  (%p959_p4), %s401_s16, 128, %s403_s6, %s371_s28  }
 0x23f   : > { %p290_p5 = scmp.lt.s32.totalorder %s914_s25, 1 }
 0x241   : > { %s1088_s25 = smov (!%p290_p5, %s914_s25), 1 }
 0x242   : > { %s562_s22 = sshll.u32 %s1088_s25, 3 }
 0x243   : > { %s293_s26 = scalar_lea.vmem %s1069_s3, %s562_s22 }
 0x287   : > { %v358_v23 = vpop.permute.xlu2 %357 }
 0x288   : > { %360 = vst.msk [vmem:[%s293_s26] sm:$0xff] %vm350_vm2, %v358_v23 }
 0x289 PF: > { %s421_s8 = sand.u32 1, %s840_s18   ;;  %p1082_p12 = scmp.ge.s32.totalorder %s852_s21, 2 }
 0x28a   : > { %s422_s23 = scalar_lea.sflag [#allocation4], %s421_s8 }
 0x28b   : > { %p606_p7 = pnand %p1082_p12, %p963_p6 }
 0x28d   : > { %p607_p8 = pneg %p606_p7 }
 0x28f   : > { %831 = dma.done.wait (%p607_p8), %s422_s23, 128  }
 0x290   : > { %833 = vsyncadd (%p607_p8), %s422_s23, 4294967168  ;;  %s432_s25 = scalar_lea.sflag [#allocation10], %s421_s8 }
 0x291   : > { %835 = dma.done.wait (%p607_p8), %s432_s25, 128  }
 0x292   : > { %837 = vsyncadd (%p607_p8), %s432_s25, 4294967168  ;;  %p23_p4 = scmp.ge.s32.totalorder %s933_s12, 4   ;;  %s1083_s18 = smov %s844_s19 }
 0x293   : > { %s1084_s19 = smov %s848_s20  ;;  %s1085_s20 = smov %s944_s15 }
 0x294   : > { %s1086_s21 = smov %s933_s12  ;;  %25 = sbr.rel (!%p23_p4) target bundleno = 8 (0x8), region = 114 }
 0x299   :  { %438 = vsyncpa [#allocation3], 1 }
 0x29a   :  { %440 = vsyncpa [#allocation3 + $0x1], 1 }
 0x29b   :  { %441 = vsyncpa [#allocation6], 1 }
 0x29c   :  { %442 = vsyncpa [#allocation4], 1 }
 0x29d   :  { %444 = vsyncpa [#allocation4 + $0x1], 1 }
 0x29e   :  { %445 = vsyncpa [#allocation10], 1 }
 0x29f   :  { %447 = vsyncpa [#allocation10 + $0x1], 1 }

</bundles_post_ra>
